<compile_context>
chip_gen: v5e
topology: v5e:2x2
jax: 0.10.0
libtpu: 0.0.40
codegen_flags: <defaults>
</compile_context>

<pallas_src>
import functools

import jax
import jax.numpy as jnp
from jax.experimental import pallas as pl
from jax.experimental.pallas import tpu as pltpu


# --------------------------------------------------------------------------
# Kernel
# --------------------------------------------------------------------------
def _fm_kernel(bias_ref, sparse_ref, dense_ref, w_ref, out_ref, *,
               num_fields: int, factor_dim: int):
    """One batch tile of the FM forward.

    bias_ref   : (1, 1)     f32, SMEM
    sparse_ref : (TB, D)    input dtype
    dense_ref  : (TB, F*K)  input dtype (fields x factors, flattened)
    w_ref      : (1, D)     f32, resident across grid steps
    out_ref    : (TB, 1)    f32
    """
    # f32 accumulation throughout (required on v5e: no bf16 VPU arithmetic).
    sparse = sparse_ref[...].astype(jnp.float32)     # (TB, D)
    dense = dense_ref[...].astype(jnp.float32)       # (TB, F*K)
    w = w_ref[...]                                   # (1, D)
    b = bias_ref[0, 0]                               # scalar from SMEM

    # Linear term: VPU multiply + XLU lane reduce. No MXU round-trip for a
    # single-output-column matmul.
    y_linear = jnp.sum(sparse * w, axis=-1, keepdims=True) + b          # (TB, 1)

    # Pairwise term: 0.5 * [ sum_k (sum_f x_fk)^2 - sum_{f,k} x_fk^2 ]
    # Per-factor field sum via an unrolled loop of static lane slices of the
    # flat (TB, F*K) tile -- avoids an in-kernel reshape back to (TB, F, K)
    # and the lane->sublane relayout that would imply.
    k = factor_dim
    sum_over_fields = dense[:, 0:k]                                      # (TB, K)
    for f in range(1, num_fields):
        sum_over_fields = sum_over_fields + dense[:, f * k:(f + 1) * k]
    sq_of_sum = jnp.sum(sum_over_fields * sum_over_fields,
                        axis=-1, keepdims=True)                          # (TB, 1)
    sum_of_sq = jnp.sum(dense * dense, axis=-1, keepdims=True)           # (TB, 1)
    y_pairwise = 0.5 * (sq_of_sum - sum_of_sq)                           # (TB, 1)

    # 2-D store: output stays (TB, 1); wrapper squeezes.
    out_ref[...] = (y_linear + y_pairwise).astype(out_ref.dtype)


# --------------------------------------------------------------------------
# Sizing helpers (chip-aware, VMEM-budget-driven)
# --------------------------------------------------------------------------
def _vmem_capacity_bytes() -> int:
    try:
        return int(pltpu.get_tpu_info().vmem_capacity_bytes)
    except Exception:
        return 64 * 1024 * 1024   # conservative fallback (v7x: 64 MiB / TC)


def _sublane(dtype) -> int:
    # f32 -> 8 sublanes, bf16/fp16 -> 16, int8/fp8 -> 32 (sublane packing).
    return max(8, 32 // jnp.dtype(dtype).itemsize)


def _align_down(x: int, m: int) -> int:
    return (x // m) * m


def _align_up(x: int, m: int) -> int:
    return -(-x // m) * m


def _pick_block_batch(batch, input_dim, fk, sparse_dtype, dense_dtype,
                      vmem_budget_bytes) -> int:
    sublane = max(_sublane(sparse_dtype), _sublane(dense_dtype))
    if batch < 2 * sublane:
        # One block equal to the full batch dim (always a legal block shape).
        return batch
    s_bytes = jnp.dtype(sparse_dtype).itemsize
    d_bytes = jnp.dtype(dense_dtype).itemsize
    # Per-row VMEM: 2x double-buffered input tiles + ~1x f32 working copies
    # + output.
    per_row = (2 * (s_bytes * input_dim + d_bytes * fk)
               + 4 * (input_dim + fk) + 2 * 4)
    bb = max(sublane, _align_down(vmem_budget_bytes // max(per_row, 1), sublane))
    # Keep >= 2 grid steps so a megacore-sharded (v7x) parallel axis feeds
    # both TensorCores; costs ~0.35 us of per-step overhead on single-TC
    # chips, which is negligible for a streaming kernel.
    bb = min(bb, _align_up(-(-batch // 2), sublane))
    return max(sublane, bb)


# --------------------------------------------------------------------------
# Wrapper
# --------------------------------------------------------------------------
@functools.partial(jax.jit, static_argnames=("block_batch", "vmem_limit_bytes"))
def fm_layer(sparse_x, dense_x, weight, bias, *,
             block_batch: int | None = None,
             vmem_limit_bytes: int | None = None):
    """FM layer forward.

    sparse_x : (batch, input_dim)              any float dtype (bf16 halves BW)
    dense_x  : (batch, num_fields, factor_dim) any float dtype
    weight   : (1, input_dim) [torch layout], (input_dim, 1) or (input_dim,)
    bias     : single-element array / scalar
    Returns  : (batch,) float32
    """
    batch, input_dim = sparse_x.shape
    b2, num_fields, factor_dim = dense_x.shape
    assert b2 == batch
    fk = num_fields * factor_dim

    # NOTE: for production, pad input_dim (and weight) to a multiple of 128
    # once at model-init time so streaming loads stay lane-dense; not done
    # per-call here to keep the hot path copy-free.

    w_row = jnp.asarray(weight, jnp.float32).reshape(1, input_dim)
    bias_2d = jnp.asarray(bias, jnp.float32).reshape(1, 1)
    # Contiguous row-major reshape -> free in XLA; gives a lane-dense 2-D tile.
    dense_flat = dense_x.reshape(batch, fk)

    vmem_cap = _vmem_capacity_bytes()
    if vmem_limit_bytes is None:
        vmem_limit_bytes = int(0.75 * vmem_cap)
    if block_batch is None:
        block_batch = _pick_block_batch(batch, input_dim, fk,
                                        sparse_x.dtype, dense_x.dtype,
                                        int(0.6 * vmem_cap))

    # No host-side padding: Pallas handles the ragged last block; rows are
    # independent so out-of-range rows never affect valid outputs.
    grid = (pl.cdiv(batch, block_batch),)
    eff_rows = grid[0] * block_batch

    s_bytes = jnp.dtype(sparse_x.dtype).itemsize
    d_bytes = jnp.dtype(dense_x.dtype).itemsize
    cost = pl.CostEstimate(
        # MAC = 2 flops: linear 2*D; field-sum (F-1)*K adds; squares+reduces
        # ~2*K + 3*F*K; combine ~4.
        flops=int(eff_rows * (2 * input_dim + 4 * fk + 2 * factor_dim + 4)),
        transcendentals=0,
        bytes_accessed=int(eff_rows * (s_bytes * input_dim + d_bytes * fk + 4)
                           + 4 * input_dim + 4),
    )

    kernel = functools.partial(_fm_kernel,
                               num_fields=num_fields, factor_dim=factor_dim)

    out2d = pl.pallas_call(
        kernel,
        out_shape=jax.ShapeDtypeStruct((batch, 1), jnp.float32),
        grid=grid,
        in_specs=[
            # bias scalar, untiled, lives in SMEM
            pl.BlockSpec(memory_space=pltpu.MemorySpace.SMEM),
            # sparse_x: (TB, D) tile per grid step
            pl.BlockSpec((block_batch, input_dim), lambda i: (i, 0)),
            # dense_x (flattened): (TB, F*K) tile per grid step
            pl.BlockSpec((block_batch, fk), lambda i: (i, 0)),
            # weight row: same block every step -> resident in VMEM
            pl.BlockSpec((1, input_dim), lambda i: (0, 0)),
        ],
        out_specs=pl.BlockSpec((block_batch, 1), lambda i: (i, 0)),
        compiler_params=pltpu.CompilerParams(
            # Batch tiles are independent -> megacore-shard on v7x.
            dimension_semantics=("parallel",),
            vmem_limit_bytes=int(vmem_limit_bytes),
        ),
        cost_estimate=cost,
    )(bias_2d, sparse_x, dense_flat, w_row)

    return out2d[:, 0]


# --------------------------------------------------------------------------
# Plain-JAX reference (mirrors the PyTorch forward)
# --------------------------------------------------------------------------
def fm_layer_ref(sparse_x, dense_x, weight, bias):
    w_row = jnp.asarray(weight, jnp.float32).reshape(1, -1)
    y_linear = (sparse_x.astype(jnp.float32) @ w_row.T
                + jnp.asarray(bias, jnp.float32).reshape(1, 1))
    d = dense_x.astype(jnp.float32)
    square_of_sum = jnp.sum(d, axis=1) ** 2
    sum_of_square = jnp.sum(d ** 2, axis=1)
    y_pairwise = 0.5 * jnp.sum(square_of_sum - sum_of_square, axis=1)
    return y_linear[:, 0] + y_pairwise


if __name__ == "__main__":
    key = jax.random.PRNGKey(0)
    k_w, k_sparse, k_dense = jax.random.split(key, 3)

    batch = 8
    input_dim = 32
    num_fields = 4
    factor_dim = 8

    # Parameter init matching the module: weight ~ N(0, 0.01), bias = 0.
    # Torch layout: nn.Linear(input_dim, 1).weight has shape (1, input_dim).
    weight = (0.01 * jax.random.normal(k_w, (1, input_dim))).astype(jnp.float32)
    bias = jnp.zeros((1,), jnp.float32)

    sparse_x = jax.random.bernoulli(
        k_sparse, 0.3, (batch, input_dim)).astype(jnp.float32)
    dense_x = jax.random.normal(
        k_dense, (batch, num_fields, factor_dim)).astype(jnp.float32)

    # f32 path
    y = jax.block_until_ready(fm_layer(sparse_x, dense_x, weight, bias))
    y_ref = fm_layer_ref(sparse_x, dense_x, weight, bias)
    assert y.shape == (batch,)
    assert jnp.allclose(y, y_ref, atol=1e-5, rtol=1e-5), (y, y_ref)

    # bf16 input path (streams half the bytes; f32 accumulation in-kernel).
    sparse_bf = sparse_x.astype(jnp.bfloat16)
    dense_bf = dense_x.astype(jnp.bfloat16)
    y_bf = jax.block_until_ready(fm_layer(sparse_bf, dense_bf, weight, bias))
    y_bf_ref = fm_layer_ref(sparse_bf, dense_bf, weight, bias)
    assert jnp.allclose(y_bf, y_bf_ref, atol=1e-3, rtol=1e-3), (y_bf, y_bf_ref)

    print("KERNEL_OK")
</pallas_src>

<mosaic_0001>
module attributes {stable_mosaic.version = 11 : i64} {
  func.func @_fm_kernel(%arg0: i32, %arg1: memref<1x1xf32, #tpu.memory_space<smem>>, %arg2: memref<8x32xf32, #tpu.memory_space<vmem>>, %arg3: memref<8x32xf32, #tpu.memory_space<vmem>>, %arg4: memref<1x32xf32, #tpu.memory_space<vmem>>, %arg5: memref<8x1xf32, #tpu.memory_space<vmem>>) attributes {dimension_semantics = [#tpu.dimension_semantics<parallel>], iteration_bounds = array<i64: 1>, scalar_prefetch = 0 : i64, scratch_operands = 0 : i64, tpu.core_type = #tpu.core_type<tc>, window_params = [{transform_indices = @transform_0, window_bounds = array<i64: 1, 1>}, {transform_indices = @transform_1, window_bounds = array<i64: 8, 32>}, {transform_indices = @transform_2, window_bounds = array<i64: 8, 32>}, {pipeline_mode = #tpu.pipeline_mode<synchronous>, transform_indices = @transform_3, window_bounds = array<i64: 1, 32>}, {transform_indices = @transform_4, window_bounds = array<i64: 8, 1>}]} {
    %c0 = arith.constant 0 : index
    %c0_0 = arith.constant 0 : index
    %0 = vector.load %arg2[%c0, %c0_0] : memref<8x32xf32, #tpu.memory_space<vmem>>, vector<8x32xf32>
    %c0_1 = arith.constant 0 : index
    %c0_2 = arith.constant 0 : index
    %1 = vector.load %arg3[%c0_1, %c0_2] : memref<8x32xf32, #tpu.memory_space<vmem>>, vector<8x32xf32>
    %c0_3 = arith.constant 0 : index
    %c0_4 = arith.constant 0 : index
    %2 = vector.load %arg4[%c0_3, %c0_4] : memref<1x32xf32, #tpu.memory_space<vmem>>, vector<1x32xf32>
    %c0_5 = arith.constant 0 : index
    %c0_6 = arith.constant 0 : index
    %3 = memref.load %arg1[%c0_5, %c0_6] : memref<1x1xf32, #tpu.memory_space<smem>>
    %4 = vector.broadcast %2 : vector<1x32xf32> to vector<8x32xf32>
    %5 = arith.mulf %0, %4 : vector<8x32xf32>
    %cst = arith.constant dense<0.000000e+00> : vector<8xf32>
    %6 = vector.multi_reduction <add>, %5, %cst [1] : vector<8x32xf32> to vector<8xf32>
    %7 = vector.shape_cast %6 : vector<8xf32> to vector<8x1xf32>
    %8 = vector.broadcast %3 : f32 to vector<8x1xf32>
    %9 = arith.addf %7, %8 : vector<8x1xf32>
    %10 = vector.extract_strided_slice %1 {offsets = [0, 0], sizes = [8, 8], strides = [1, 1]} : vector<8x32xf32> to vector<8x8xf32>
    %11 = vector.extract_strided_slice %1 {offsets = [0, 8], sizes = [8, 8], strides = [1, 1]} : vector<8x32xf32> to vector<8x8xf32>
    %12 = arith.addf %10, %11 : vector<8x8xf32>
    %13 = vector.extract_strided_slice %1 {offsets = [0, 16], sizes = [8, 8], strides = [1, 1]} : vector<8x32xf32> to vector<8x8xf32>
    %14 = arith.addf %12, %13 : vector<8x8xf32>
    %15 = vector.extract_strided_slice %1 {offsets = [0, 24], sizes = [8, 8], strides = [1, 1]} : vector<8x32xf32> to vector<8x8xf32>
    %16 = arith.addf %14, %15 : vector<8x8xf32>
    %17 = arith.mulf %16, %16 : vector<8x8xf32>
    %cst_7 = arith.constant dense<0.000000e+00> : vector<8xf32>
    %18 = vector.multi_reduction <add>, %17, %cst_7 [1] : vector<8x8xf32> to vector<8xf32>
    %19 = vector.shape_cast %18 : vector<8xf32> to vector<8x1xf32>
    %20 = arith.mulf %1, %1 : vector<8x32xf32>
    %cst_8 = arith.constant dense<0.000000e+00> : vector<8xf32>
    %21 = vector.multi_reduction <add>, %20, %cst_8 [1] : vector<8x32xf32> to vector<8xf32>
    %22 = vector.shape_cast %21 : vector<8xf32> to vector<8x1xf32>
    %23 = arith.subf %19, %22 : vector<8x1xf32>
    %cst_9 = arith.constant 5.000000e-01 : f32
    %24 = vector.broadcast %cst_9 : f32 to vector<8x1xf32>
    %25 = arith.mulf %24, %23 : vector<8x1xf32>
    %26 = arith.addf %9, %25 : vector<8x1xf32>
    %c0_10 = arith.constant 0 : index
    %c0_11 = arith.constant 0 : index
    %27 = vector.load %arg5[%c0_10, %c0_11] : memref<8x1xf32, #tpu.memory_space<vmem>>, vector<8x1xf32>
    tpu.vector_store %arg5[%c0_10, %c0_11], %26 {strides = array<i32>} : memref<8x1xf32, #tpu.memory_space<vmem>>, vector<8x1xf32>,
    return
  }
  func.func @transform_0(%arg0: i32) -> (i32, i32) {
    %c0_i32 = arith.constant 0 : i32
    %c0_i32_0 = arith.constant 0 : i32
    %c0_i32_1 = arith.constant 0 : i32
    return %c0_i32, %c0_i32_0 : i32, i32
  }
  func.func @transform_1(%arg0: i32) -> (i32, i32) {
    %c0_i32 = arith.constant 0 : i32
    %c0_i32_0 = arith.constant 0 : i32
    return %arg0, %c0_i32 : i32, i32
  }
  func.func @transform_2(%arg0: i32) -> (i32, i32) {
    %c0_i32 = arith.constant 0 : i32
    %c0_i32_0 = arith.constant 0 : i32
    return %arg0, %c0_i32 : i32, i32
  }
  func.func @transform_3(%arg0: i32) -> (i32, i32) {
    %c0_i32 = arith.constant 0 : i32
    %c0_i32_0 = arith.constant 0 : i32
    %c0_i32_1 = arith.constant 0 : i32
    return %c0_i32, %c0_i32_0 : i32, i32
  }
  func.func @transform_4(%arg0: i32) -> (i32, i32) {
    %c0_i32 = arith.constant 0 : i32
    %c0_i32_0 = arith.constant 0 : i32
    return %arg0, %c0_i32 : i32, i32
  }
}

</mosaic_0001>

<bundles_post_ra>
// kernel: fm_layer.1
= control target key start
LH: loop header
LB: loop body
LE: loop exit
PB: predicated region body
PF: predicated region fallthrough
CT: control target
= control target key end

     0   :  { %s67_s17 = smov 120   ;;  %s68_s18 = smov 104   ;;  %vm26_vm0 = vcmask 261120   ;;  %vm46_vm1 = vcmask 64512   ;;  %vm57_vm2 = vcmask 7168   ;;  %s110_s2 = inlined_call_operand.vmem [shape: f32[8,32], index: 2, kind: input, shape index: {}]   ;;  %s111_s3 = inlined_call_operand.vmem [shape: f32[1,32], index: 3, kind: input, shape index: {}]   ;;  %s112_s1 = inlined_call_operand.vmem [shape: f32[8,32], index: 1, kind: input, shape index: {}]   ;;  %s113_s0 = inlined_call_operand.<no memory space> [shape: f32[1,1], index: 0, kind: input, shape index: {}]   ;;  %s114_s4 = inlined_call_operand.vmem [shape: f32[8,1], index: 4, kind: output, shape index: {}]  }
   0x1   :  { %v19_v0 = vld [vmem:[%s110_s2] sm:$0xff]  ;;  %s69_s19 = smov 112   ;;  %v30_v17 = vstv %s113_s0 }
   0x2   :  { %33 = vrot.lane.b32.xlu0 %v19_v0, %s67_s17  ;;  %41 = vrot.lane.b32.xlu1 %v19_v0, %s68_s18  ;;  %v50_v1 = vmul.f32 %v19_v0, %v19_v0  ;;  %v66_v3 = vld [vmem:[%s111_s3] ss:$0 sm:$0xff] }
   0x3   :  { %v18_v4 = vld [vmem:[%s112_s1] sm:$0xff] }
   0x4   :  { %v51_v2 = vsel %vm26_vm0, %v50_v1, 0.0  ;;  %v25_v5 = vmul.f32 %v66_v3, %v18_v4 }
   0x5   :  { %52 = vadd.xlane.f32.xlu2 %v51_v2 }
   0x6   :  { %v27_v6 = vsel %vm26_vm0, %v25_v5, 0.0 }
   0xa   :  { %37 = vrot.lane.b32.xlu0 %v19_v0, %s69_s19 }
   0xd   :  { %28 = vadd.xlane.f32.xlu2 %v27_v6 }
  0x74   :  { %v34_v7 = vpop.permute.xlu0 %33  ;;  %v42_v10 = vpop.permute.xlu1 %41 }
  0x75   :  { %v36_v8 = vadd.f32 %v34_v7, %v19_v0 }
  0x78   :  { %v53_v15 = vpop.xlane.xlu2 %52 }
  0x7c   :  { %v38_v9 = vpop.permute.xlu0 %37 }
  0x7d   :  { %v40_v11 = vadd.f32 %v38_v9, %v36_v8 }
  0x7f   :  { %v44_v12 = vadd.f32 %v42_v10, %v40_v11 }
  0x80   :  { %v29_v16 = vpop.xlane.xlu2 %28 }
  0x81   :  { %v45_v13 = vmul.f32 %v44_v12, %v44_v12  ;;  %v31_v20 = vadd.f32 %v30_v17, %v29_v16 }
  0x83   :  { %v47_v14 = vsel %vm46_vm1, %v45_v13, 0.0 }
  0x84   :  { %48 = vadd.xlane.f32.xlu1 %v47_v14 }
  0xf7   :  { %v49_v18 = vpop.xlane.xlu1 %48 }
  0xf8   :  { %v54_v19 = vsub.f32 %v49_v18, %v53_v15 }
  0xfa   :  { %v55_v21 = vmul.f32 0.5, %v54_v19 }
  0xfc   :  { %v56_v22 = vadd.f32 %v55_v21, %v31_v20 }
  0xfe   :  { %58 = vst.msk [vmem:[%s114_s4] sm:$0xff] %vm57_vm2, %v56_v22 }

</bundles_post_ra>
